<compile_context>
chip_gen: v7x
topology: tpu7x:2x2x1
jax: 0.10.0
libtpu: 0.0.40
codegen_flags: <defaults>
</compile_context>

<pallas_src>
import numpy as np
import jax
import jax.numpy as jnp
from jax.experimental import pallas as pl
from jax.experimental.pallas import tpu as pltpu

LANE = 128
SUBLANE = 8


def _round_up(n, m):
    return (n + m - 1) // m * m


def readout_kernel(x_ref, w_ref, o_ref):
    # MXU matmul (bf16 x bf16 -> f32 accumulate), then elementwise threshold in f32.
    res = jnp.dot(x_ref[...], w_ref[...], preferred_element_type=jnp.float32)
    o_ref[...] = jnp.where(res > 0.5, jnp.float32(1.0), res)


def readout_forward(x, pre_idx, w_small, dim_output, *, tm=512,
                    compute_dtype=jnp.bfloat16):
    """Forward pass of ReadoutLayer.

    x        : (batch, reservoir_size) f32
    pre_idx  : (dim_input,) int32 — reservoir columns that feed the readout
    w_small  : (dim_input, n_padded) compact one-hot weight, n_padded % 128 == 0
    returns  : (batch, dim_output) f32
    """
    batch, _ = x.shape
    dim_input, n_padded = w_small.shape

    # Sparsity fix: gather only the contributing reservoir columns (wrapper-side).
    x_sel = jnp.take(x, pre_idx, axis=1).astype(compute_dtype)   # (batch, dim_input)
    w = w_small.astype(compute_dtype)                            # exact: 0/1 values

    # Pad batch to a sublane-friendly tile grid (zeros are harmless: 0 <= 0.5).
    tm_eff = min(tm, _round_up(batch, SUBLANE))
    batch_padded = _round_up(batch, tm_eff)
    if batch_padded != batch:
        x_sel = jnp.pad(x_sel, ((0, batch_padded - batch), (0, 0)))

    grid = (batch_padded // tm_eff,)

    out = pl.pallas_call(
        readout_kernel,
        out_shape=jax.ShapeDtypeStruct((batch_padded, n_padded), jnp.float32),
        grid_spec=pl.GridSpec(
            grid=grid,
            in_specs=[
                # x tile streams over the batch; W stays resident (constant block).
                pl.BlockSpec((tm_eff, dim_input), lambda i: (i, 0)),
                pl.BlockSpec((dim_input, n_padded), lambda i: (0, 0)),
            ],
            out_specs=pl.BlockSpec((tm_eff, n_padded), lambda i: (i, 0)),
        ),
        compiler_params=pltpu.CompilerParams(
            dimension_semantics=("parallel",),   # shard batch tiles across v7x cores
        ),
    )(x_sel, w)

    return out[:batch, :dim_output]


def make_readout_params(reservoir_size, dim_input, dim_output, seed=0):
    """Deterministic synthetic init mirroring ReadoutLayer.__init__.

    Instead of the dense (reservoir_size, dim_output) transpose of the sparse W_t,
    we keep (pre indices, compact one-hot W_small) so that
        x @ W_t.T == x[:, pre] @ W_small[:, :dim_output]
    W_small's columns are zero-padded to a multiple of 128 for lane-dense stores.
    """
    rng = np.random.RandomState(seed)
    pre = rng.permutation(np.arange(reservoir_size))[:dim_input]
    post = np.arange(dim_input) % dim_output

    n_padded = _round_up(max(dim_output, LANE), LANE)
    w_small = np.zeros((dim_input, n_padded), dtype=np.float32)
    w_small[np.arange(dim_input), post] = 1.0

    return jnp.asarray(pre, dtype=jnp.int32), jnp.asarray(w_small)


if __name__ == "__main__":
    reservoir_size = 32
    dim_input = 16
    dim_output = 8
    batch = 8

    pre_idx, w_small = make_readout_params(reservoir_size, dim_input, dim_output, seed=0)

    key = jax.random.PRNGKey(0)
    x = jax.random.normal(key, (batch, reservoir_size), dtype=jnp.float32)

    out = readout_forward(x, pre_idx, w_small, dim_output)
    out = jax.block_until_ready(out)
    assert out.shape == (batch, dim_output)

    # Reference in plain NumPy, with matched bf16 rounding of x (W is exact in bf16).
    # Values landing exactly at the 0.5 boundary could flip under the bf16 cast of x,
    # but that cannot happen with continuous random inputs.
    pre_np = np.asarray(pre_idx)
    post_np = np.arange(dim_input) % dim_output
    w_full = np.zeros((reservoir_size, dim_output), dtype=np.float32)
    w_full[pre_np, post_np] = 1.0
    x_ref = np.asarray(x.astype(jnp.bfloat16).astype(jnp.float32))
    ref = x_ref @ w_full
    ref = np.where(ref > 0.5, np.float32(1.0), ref)
    np.testing.assert_allclose(np.asarray(out), ref, rtol=1e-4, atol=1e-4)

    print("KERNEL_OK")
</pallas_src>

<mosaic_0001>
module attributes {stable_mosaic.version = 11 : i64} {
  func.func @readout_kernel(%arg0: i32, %arg1: memref<8x16xbf16, #tpu.memory_space<vmem>>, %arg2: memref<16x128xbf16, #tpu.memory_space<vmem>>, %arg3: memref<8x128xf32, #tpu.memory_space<vmem>>) attributes {dimension_semantics = [#tpu.dimension_semantics<parallel>], iteration_bounds = array<i64: 1>, scalar_prefetch = 0 : i64, scratch_operands = 0 : i64, tpu.core_type = #tpu.core_type<tc>, window_params = [{transform_indices = @transform_0, window_bounds = array<i64: 8, 16>}, {pipeline_mode = #tpu.pipeline_mode<synchronous>, transform_indices = @transform_1, window_bounds = array<i64: 16, 128>}, {transform_indices = @transform_2, window_bounds = array<i64: 8, 128>}]} {
    %c0 = arith.constant 0 : index
    %c0_0 = arith.constant 0 : index
    %0 = vector.load %arg1[%c0, %c0_0] : memref<8x16xbf16, #tpu.memory_space<vmem>>, vector<8x16xbf16>
    %c0_1 = arith.constant 0 : index
    %c0_2 = arith.constant 0 : index
    %1 = vector.load %arg2[%c0_1, %c0_2] : memref<16x128xbf16, #tpu.memory_space<vmem>>, vector<16x128xbf16>
    %cst = arith.constant dense<0.000000e+00> : vector<8x128xf32>
    %2 = tpu.matmul %0, %1, %cst {dimension_numbers = #tpu.dot_dimension_numbers<[1], [0], [0], [1], [0, 0, 1, 1], [], []>} : vector<8x16xbf16>, vector<16x128xbf16>, vector<8x128xf32> -> vector<8x128xf32>
    %cst_3 = arith.constant 5.000000e-01 : f32
    %3 = vector.broadcast %cst_3 : f32 to vector<8x128xf32>
    %4 = arith.cmpf ogt, %2, %3 : vector<8x128xf32>
    %cst_4 = arith.constant 1.000000e+00 : f32
    %5 = vector.broadcast %cst_4 : f32 to vector<8x128xf32>
    %6 = arith.select %4, %5, %2 : vector<8x128xi1>, vector<8x128xf32>
    %c0_5 = arith.constant 0 : index
    %c0_6 = arith.constant 0 : index
    %7 = vector.load %arg3[%c0_5, %c0_6] : memref<8x128xf32, #tpu.memory_space<vmem>>, vector<8x128xf32>
    tpu.vector_store %arg3[%c0_5, %c0_6], %6 {strides = array<i32>} : memref<8x128xf32, #tpu.memory_space<vmem>>, vector<8x128xf32>,
    return
  }
  func.func @transform_0(%arg0: i32) -> (i32, i32) {
    %c0_i32 = arith.constant 0 : i32
    %c0_i32_0 = arith.constant 0 : i32
    return %arg0, %c0_i32 : i32, i32
  }
  func.func @transform_1(%arg0: i32) -> (i32, i32) {
    %c0_i32 = arith.constant 0 : i32
    %c0_i32_0 = arith.constant 0 : i32
    %c0_i32_1 = arith.constant 0 : i32
    return %c0_i32, %c0_i32_0 : i32, i32
  }
  func.func @transform_2(%arg0: i32) -> (i32, i32) {
    %c0_i32 = arith.constant 0 : i32
    %c0_i32_0 = arith.constant 0 : i32
    return %arg0, %c0_i32 : i32, i32
  }
}

</mosaic_0001>

<bundles_post_ra>
// kernel: tpu_custom_call.1
= control target key start
LH: loop header
LB: loop body
LE: loop exit
PB: predicated region body
PF: predicated region fallthrough
CT: control target
= control target key end

     0   :  { %7 = vsyncpa [#allocation3], 0  ;;  %s266_s0 = inlined_call_operand.hbm [shape: bf16[8,16], index: 0, kind: input, shape index: {}]   ;;  %s267_s1 = inlined_call_operand.hbm [shape: bf16[16,128], index: 1, kind: input, shape index: {}]   ;;  %s268_s2 = inlined_call_operand.hbm [shape: f32[8,128], index: 2, kind: output, shape index: {}]  }
   0x1   :  { %8 = vsyncpa [#allocation6], 0 }
   0x2   :  { %9 = vsyncpa [#allocation4], 0  ;;  %s201_s9 = smov [#allocation2]   ;;  %s202_s11 = smov [#allocation5]  }
   0x3   :  { %s16_s10 = sshll.u32 %s201_s9, 4  ;;  %s25_s12 = sshll.u32 %s202_s11, 4  ;;  %s17_s10 = int_to_ptr.vmem [resolvable:$true] %s16_s10  ;;  %s223_s12 = int_to_ptr.vmem [resolvable:$true] %s25_s12 }
   0x4   :  { %s129_s15 = scalar_lea.hbm %s266_s0, 64 }
   0x5   :  { %p130_p0 = scmp.ne.s32.totalorder %s266_s0, %s129_s15  ;;  %p133_p1 = scmp.lt.u32.totalorder %s129_s15, %s266_s0 }
   0x7   :  { %p135_p2 = pnand %p133_p1, %p130_p0 }
   0x9   :  { %138 = shalt.err (!%p135_p2)
}
   0xa   :  { %s139_s20 = scalar_lea.vmem %s17_s10, 64  ;;  %p144_p4 = scmp.lt.s32.totalorder %s17_s10, %s17_s10 }
   0xb   :  { %p140_p3 = scmp.ne.s32.totalorder %s17_s10, %s139_s20  ;;  %p145_p5 = scmp.lt.s32.totalorder %s139_s20, %s139_s20 }
   0xd   :  { %p146_p6 = por %p145_p5, %p144_p4 }
   0xf   :  { %p147_p7 = pnand %p146_p6, %p140_p3 }
  0x11   :  { %150 = shalt.err (!%p147_p7)
}
  0x12   :  { %19 = dma.hbm_to_vmem [thread:$0]  %s266_s0, 64, %s17_s10, [#allocation3]  }
  0x13   :  { %s151_s25 = scalar_lea.hbm %s267_s1, 128 }
  0x14   :  { %p152_p8 = scmp.ne.s32.totalorder %s267_s1, %s151_s25  ;;  %p155_p9 = scmp.lt.u32.totalorder %s151_s25, %s267_s1 }
  0x16   :  { %p157_p10 = pnand %p155_p9, %p152_p8 }
  0x18   :  { %160 = shalt.err (!%p157_p10)
}
  0x19   :  { %s161_s30 = scalar_lea.vmem %s223_s12, 128  ;;  %p166_p12 = scmp.lt.s32.totalorder %s223_s12, %s223_s12 }
  0x1a   :  { %p162_p11 = scmp.ne.s32.totalorder %s223_s12, %s161_s30  ;;  %p167_p13 = scmp.lt.s32.totalorder %s161_s30, %s161_s30 }
  0x1c   :  { %p168_p0 = por %p167_p13, %p166_p12 }
  0x1e   :  { %p169_p1 = pnand %p168_p0, %p162_p11 }
  0x20   :  { %172 = shalt.err (!%p169_p1)
}
  0x21   :  { %s203_s0 = smov 64   ;;  %s204_s3 = smov 4  }
  0x22   :  { %31 = dma.hbm_to_vmem [thread:$0]  %s267_s1, 128, %s223_s12, [#allocation6], %s203_s0, %s203_s0, %s204_s3  }
  0x23   :  { %195 = dma.done.wait [#allocation3], 64  }
  0x24   :  { %196 = vsyncadd [#allocation3], 4294967232 }
  0x25   :  { %197 = dma.done.wait [#allocation6], 128  }
  0x26   :  { %198 = vsyncadd [#allocation6], 4294967168  ;;  %v205_v0 = vmov 0.0   ;;  %vm206_vm0 = vmmov 0   ;;  %v128_v1 = vld [vmem:[#allocation5] sm:$0xff]   ;;  %vm48_vm1 = vcmask 130048  }
  0x27   :  { %115 = vmatprep.subr.bf16.mxu0 %v205_v0  ;;  %117 = vmatprep.mubr.msk.bf16.mxu0 %vm206_vm0, %v205_v0  ;;  %v39_v2 = vld [vmem:[#allocation2] sm:$0xf]  ;;  %s207_s6 = smov [#allocation7]  }
  0x28   :  { %116 = vmatpush3.bf16.msra.mxu0 %v128_v1  ;;  %s101_s7 = sshll.u32 %s207_s6, 4  ;;  %s102_s7 = int_to_ptr.vmem [resolvable:$true] %s101_s7 }
  0x29   :  { %s173_s1 = scalar_lea.vmem %s102_s7, 128  ;;  %p178_p3 = scmp.lt.s32.totalorder %s102_s7, %s102_s7 }
  0x2a   :  { %p174_p2 = scmp.ne.s32.totalorder %s102_s7, %s173_s1  ;;  %p179_p4 = scmp.lt.s32.totalorder %s173_s1, %s173_s1 }
  0x2b   :  { %118 = vmatmul.mubr.msk.bf16.vlgmr.msra.gmra.mrb[0].mxu0 %vm48_vm1, %v39_v2 }
  0x2c   :  { %p180_p5 = por %p179_p4, %p178_p3 }
  0x2e   :  { %p181_p6 = pnand %p180_p5, %p174_p2 }
  0xfe   :  { %v86_v3 = vpop.f32.mrb[0].mxu0 }
  0xff   :  { %vm92_vm2 = vcmp.gt.f32.partialorder %v86_v3, 0.5  ;;  %v119_v4 = vpop.f32.mrb[1].mxu0 }
 0x100   :  { %v93_v5 = vsel %vm92_vm2, 1.0, %v86_v3  ;;  %v89_v6 = vpop.f32.mrb[2].mxu0 }
 0x101   :  { %94 = vst [vmem:[#allocation7] sm:$0xff] %v93_v5  ;;  %v120_v7 = vpop.f32.mrb[3].mxu0 }
 0x102   :  { %184 = shalt.err (!%p181_p6)
}
 0x103   :  { %s185_s10 = scalar_lea.hbm %s268_s2, 128 }
 0x104   :  { %p186_p7 = scmp.ne.s32.totalorder %s268_s2, %s185_s10  ;;  %p189_p8 = scmp.lt.u32.totalorder %s185_s10, %s268_s2 }
 0x106   :  { %p191_p9 = pnand %p189_p8, %p186_p7 }
 0x108   :  { %194 = shalt.err (!%p191_p9)
}
 0x109   :  { %104 = dma.vmem_to_hbm [thread:$0]  %s102_s7, 128, %s268_s2, [#allocation4]  }
 0x10a   :  { %199 = dma.done.wait [#allocation4], 128  }
 0x10b   :  { %200 = vsyncadd [#allocation4], 4294967168 }
 0x10c   :  { %108 = vsyncpa [#allocation3], 1 }
 0x10d   :  { %109 = vsyncpa [#allocation6], 1 }
 0x10e   :  { %110 = vsyncpa [#allocation4], 1 }

</bundles_post_ra>
